<compile_context>
chip_gen: v6e
topology: v6e:2x2x1
jax: 0.10.0
libtpu: 0.0.40
codegen_flags: <defaults>
</compile_context>

<pallas_src>
import functools

import jax
import jax.numpy as jnp
from jax.experimental import pallas as pl
from jax.experimental.pallas import tpu as pltpu


def _round_up(x, m):
    return (x + m - 1) // m * m


def _pad_to(a, shape):
    return jnp.pad(a, [(0, s - d) for d, s in zip(a.shape, shape)])


def rnn_kernel(emb_ref, wih_ref, whh_ref, b_ref, hout_ref, xp_scr, h_scr,
               *, seq_len, mask_tail, recurrent_dtype):
    """One (batch_block, time_block) grid step of the tanh-RNN recurrence.

    emb_ref : (t_blk, bblk, Ep) bf16  time-major embedded tokens (streamed)
    wih_ref : (Ep, Hp)          bf16  input-to-hidden weights (torch W_ih.T)
    whh_ref : (Hp, Hp)          recurrent_dtype  hidden-to-hidden (torch W_hh.T)
    b_ref   : (1, Hp)           f32   b_ih + b_hh combined
    hout_ref: (bblk, Hp)        f32   final hidden state for this batch block
    xp_scr  : (t_blk*bblk, Hp)  f32   hoisted input projection scratch
    h_scr   : (bblk, Hp)        f32   hidden state, persists across time blocks
    """
    t_idx = pl.program_id(1)
    t_blk, bblk, ep = emb_ref.shape

    @pl.when(t_idx == 0)
    def _init():
        h_scr[...] = jnp.zeros_like(h_scr)

    # Hoisted input projection: one big bf16 MXU matmul for the whole block,
    # so the serial loop below only contains h @ W_hh.
    emb = emb_ref[...].reshape(t_blk * bblk, ep)
    xp_scr[...] = (jnp.dot(emb, wih_ref[...],
                           preferred_element_type=jnp.float32)
                   + b_ref[...])

    whh = whh_ref[...]                      # hoisted, time-invariant
    t_start = t_idx * t_blk

    def step(t, h):
        start = t * bblk
        if not isinstance(start, int):
            start = pl.multiple_of(start, bblk)
        x_t = xp_scr[pl.ds(start, bblk), :]
        h_new = jnp.tanh(x_t + jnp.dot(h.astype(recurrent_dtype), whh,
                                       preferred_element_type=jnp.float32))
        if mask_tail:
            # Tail steps past the real sequence length leave h unchanged.
            h_new = jnp.where(t_start + t < seq_len, h_new, h)
        return h_new

    h = h_scr[...]
    if t_blk <= 32:
        # Tiny fixed trip count: static unroll gives the scheduler full
        # visibility of the dependent h @ W_hh -> tanh chain.
        for t in range(t_blk):
            h = step(t, h)
    else:
        # Bounded unroll keeps instruction footprint / vreg pressure in check.
        h = jax.lax.fori_loop(0, t_blk, step, h, unroll=8)
    h_scr[...] = h

    @pl.when(t_idx == pl.num_programs(1) - 1)
    def _finalize():
        hout_ref[...] = h


@functools.partial(jax.jit, static_argnames=("recurrent_dtype",))
def rnn_forward(text, params, recurrent_dtype=jnp.bfloat16):
    """text: (B, T) int32 token ids.  Returns (B, output_dim) float32.

    `recurrent_dtype` controls the precision of the h @ W_hh input inside the
    serial recurrence (bf16 MXU by default; set jnp.float32 for exact-ish
    accumulation on long sequences at ~3x MXU cost).
    """
    emb_table = params["embedding"]            # (vocab, E) f32
    w_ih = params["w_ih"]                      # (E, H)   (torch weight .T)
    w_hh = params["w_hh"]                      # (H, H)
    b = params["b"]                            # (1, H)   b_ih + b_hh
    w_fc = params["w_fc"]                      # (H, O)
    b_fc = params["b_fc"]                      # (1, O)

    B, T = text.shape
    E, H = w_ih.shape

    # Lane/sublane-dense padded sizes (zero padding -> exact results).
    Ep = _round_up(E, 128)
    Hp = _round_up(H, 128)

    # Batch blocks: split across two blocks only when big enough to feed both
    # v7x TensorCores; on 1-TC chips the extra block would just serialize.
    Bp = _round_up(B, 8)
    n_bblk = 2 if Bp >= 16 else 1
    bblk = _round_up(-(-Bp // n_bblk), 8)
    Bp_total = n_bblk * bblk

    # Balanced time blocks (cap 128): avoids the t_blk=1 cliff for awkward T;
    # any remainder steps in the last block are masked in-kernel.
    cap = 128
    n_tblk = -(-T // cap)
    t_blk = -(-T // n_tblk)
    T_pad = n_tblk * t_blk
    mask_tail = (T_pad != T)
    rows = t_blk * bblk

    # Embedding gather: time-major, bf16, straight into the padded layout.
    emb_table_bf16 = emb_table.astype(jnp.bfloat16)
    embedded = jnp.take(emb_table_bf16, text.T, axis=0)       # (T, B, E) bf16
    embedded = _pad_to(embedded, (T_pad, Bp_total, Ep))        # (T_pad, Bp, Ep)

    w_ih_p = _pad_to(w_ih, (Ep, Hp)).astype(jnp.bfloat16)
    w_hh_p = _pad_to(w_hh, (Hp, Hp)).astype(recurrent_dtype)
    b_p = _pad_to(b, (1, Hp)).astype(jnp.float32)

    # Explicit VMEM budget: 2x streamed emb block + single-buffered weights +
    # scratches + output block, with 2x headroom.
    itemsize_rec = jnp.dtype(recurrent_dtype).itemsize
    emb_block_bytes = rows * Ep * 2
    weight_bytes = Ep * Hp * 2 + Hp * Hp * itemsize_rec + Hp * 4
    scratch_bytes = (rows * Hp + bblk * Hp) * 4
    out_bytes = bblk * Hp * 4
    need = 2 * emb_block_bytes + weight_bytes + scratch_bytes + 2 * out_bytes
    vmem_limit = int(min(128 * 1024 * 1024, max(32 * 1024 * 1024, 2 * need)))

    kernel = functools.partial(rnn_kernel, seq_len=T, mask_tail=mask_tail,
                               recurrent_dtype=recurrent_dtype)

    h_out = pl.pallas_call(
        kernel,
        out_shape=jax.ShapeDtypeStruct((Bp_total, Hp), jnp.float32),
        grid_spec=pltpu.PrefetchScalarGridSpec(
            num_scalar_prefetch=0,
            grid=(n_bblk, n_tblk),
            in_specs=[
                # Streamed activation block (double-buffered by default).
                pl.BlockSpec((t_blk, bblk, Ep), lambda bi, ti: (ti, bi, 0)),
                # Resident weights: constant index -> single-buffered.
                pl.BlockSpec((Ep, Hp), lambda bi, ti: (0, 0),
                             pipeline_mode=pl.Buffered(1)),
                pl.BlockSpec((Hp, Hp), lambda bi, ti: (0, 0),
                             pipeline_mode=pl.Buffered(1)),
                pl.BlockSpec((1, Hp), lambda bi, ti: (0, 0),
                             pipeline_mode=pl.Buffered(1)),
            ],
            out_specs=pl.BlockSpec((bblk, Hp), lambda bi, ti: (bi, 0)),
            scratch_shapes=[
                pltpu.VMEM((rows, Hp), jnp.float32),   # xp (input projection)
                pltpu.VMEM((bblk, Hp), jnp.float32),   # persistent hidden state
            ],
        ),
        compiler_params=pltpu.CompilerParams(
            dimension_semantics=("parallel", "arbitrary"),
            vmem_limit_bytes=vmem_limit),
    )(embedded, w_ih_p, w_hh_p, b_p)

    # Final FC on the last hidden state: one small GEMM, left to XLA so the
    # FC weights never occupy kernel VMEM.
    h_last = h_out[:B, :H]
    return h_last @ w_fc + b_fc


def make_params(key, vocab, emb_dim, hidden_dim, out_dim):
    ks = jax.random.split(key, 7)
    s_rnn = 1.0 / jnp.sqrt(hidden_dim)
    s_fc = 1.0 / jnp.sqrt(hidden_dim)
    return {
        "embedding": jax.random.normal(ks[0], (vocab, emb_dim), jnp.float32),
        # stored as (in, out) = torch weight .T
        "w_ih": jax.random.uniform(ks[1], (emb_dim, hidden_dim), jnp.float32,
                                   -s_rnn, s_rnn),
        "w_hh": jax.random.uniform(ks[2], (hidden_dim, hidden_dim), jnp.float32,
                                   -s_rnn, s_rnn),
        "b": (jax.random.uniform(ks[3], (1, hidden_dim), jnp.float32, -s_rnn, s_rnn)
              + jax.random.uniform(ks[4], (1, hidden_dim), jnp.float32, -s_rnn, s_rnn)),
        "w_fc": jax.random.uniform(ks[5], (hidden_dim, out_dim), jnp.float32,
                                   -s_fc, s_fc),
        "b_fc": jax.random.uniform(ks[6], (1, out_dim), jnp.float32, -s_fc, s_fc),
    }


def rnn_forward_ref_f32(text, params):
    """Pure-f32 reference matching the PyTorch module semantics."""
    emb = jnp.take(params["embedding"], text, axis=0)  # (B, T, E)
    B, T, _ = emb.shape
    H = params["w_hh"].shape[0]
    h = jnp.zeros((B, H), jnp.float32)
    for t in range(T):
        h = jnp.tanh(emb[:, t, :] @ params["w_ih"] + h @ params["w_hh"]
                     + params["b"])
    return h @ params["w_fc"] + params["b_fc"]


def rnn_forward_ref_bf16(text, params):
    """Reference using the kernel's bf16-input / f32-accumulate matmul policy."""
    emb = jnp.take(params["embedding"].astype(jnp.bfloat16), text, axis=0)
    wih = params["w_ih"].astype(jnp.bfloat16)
    whh = params["w_hh"].astype(jnp.bfloat16)
    B, T, _ = emb.shape
    H = params["w_hh"].shape[0]
    h = jnp.zeros((B, H), jnp.float32)
    for t in range(T):
        pre = (jnp.dot(emb[:, t, :], wih, preferred_element_type=jnp.float32)
               + jnp.dot(h.astype(jnp.bfloat16), whh,
                         preferred_element_type=jnp.float32)
               + params["b"])
        h = jnp.tanh(pre)
    return h @ params["w_fc"] + params["b_fc"]


if __name__ == "__main__":
    key = jax.random.PRNGKey(0)
    k_par, k_txt = jax.random.split(key)

    VOCAB, EMB, HID, OUT = 50, 32, 32, 8
    B, T = 2, 8

    params = make_params(k_par, VOCAB, EMB, HID, OUT)
    text = jax.random.randint(k_txt, (B, T), 0, VOCAB, dtype=jnp.int32)

    out = rnn_forward(text, params)
    out = jax.block_until_ready(out)
    assert out.shape == (B, OUT)

    # Tight check vs. a reference with identical bf16/f32 mixed precision.
    ref_matched = rnn_forward_ref_bf16(text, params)
    assert bool(jnp.allclose(out, ref_matched, atol=2e-3, rtol=2e-3)), \
        "mismatch vs bf16-matched reference"

    # Looser check vs. the pure-f32 PyTorch-module semantics.
    ref_f32 = rnn_forward_ref_f32(text, params)
    assert bool(jnp.allclose(out, ref_f32, atol=5e-2, rtol=5e-2)), \
        "mismatch vs f32 module reference"

    print("KERNEL_OK")
</pallas_src>

<mosaic_0001>
module attributes {stable_mosaic.version = 11 : i64} {
  func.func @rnn_kernel(%arg0: i32, %arg1: i32, %arg2: memref<8x8x128xbf16, #tpu.memory_space<vmem>>, %arg3: memref<128x128xbf16, #tpu.memory_space<vmem>>, %arg4: memref<128x128xbf16, #tpu.memory_space<vmem>>, %arg5: memref<1x128xf32, #tpu.memory_space<vmem>>, %arg6: memref<8x128xf32, #tpu.memory_space<vmem>>, %arg7: memref<64x128xf32, #tpu.memory_space<vmem>>, %arg8: memref<8x128xf32, #tpu.memory_space<vmem>>) attributes {dimension_semantics = [#tpu.dimension_semantics<parallel>, #tpu.dimension_semantics<arbitrary>], iteration_bounds = array<i64: 1, 1>, scalar_prefetch = 0 : i64, scratch_operands = 2 : i64, tpu.core_type = #tpu.core_type<tc>, window_params = [{transform_indices = @transform_0, window_bounds = array<i64: 8, 8, 128>}, {pipeline_mode = #tpu.pipeline_mode<synchronous>, transform_indices = @transform_1, window_bounds = array<i64: 128, 128>}, {pipeline_mode = #tpu.pipeline_mode<synchronous>, transform_indices = @transform_2, window_bounds = array<i64: 128, 128>}, {pipeline_mode = #tpu.pipeline_mode<synchronous>, transform_indices = @transform_3, window_bounds = array<i64: 1, 128>}, {transform_indices = @transform_4, window_bounds = array<i64: 8, 128>}]} {
    %c0_i32 = arith.constant 0 : i32
    %0 = arith.cmpi eq, %arg1, %c0_i32 : i32
    %1 = arith.extui %0 : i1 to i32
    %c0_i32_0 = arith.constant 0 : i32
    %2 = arith.cmpi ne, %1, %c0_i32_0 : i32
    scf.if %2 {
      %cst_34 = arith.constant 0.000000e+00 : f32
      %57 = vector.broadcast %cst_34 : f32 to vector<8x128xf32>
      %c0_35 = arith.constant 0 : index
      %c0_36 = arith.constant 0 : index
      %58 = vector.load %arg8[%c0_35, %c0_36] : memref<8x128xf32, #tpu.memory_space<vmem>>, vector<8x128xf32>
      tpu.vector_store %arg8[%c0_35, %c0_36], %57 {strides = array<i32>} : memref<8x128xf32, #tpu.memory_space<vmem>>, vector<8x128xf32>,
    } else {
    }
    %c0 = arith.constant 0 : index
    %c0_1 = arith.constant 0 : index
    %c0_2 = arith.constant 0 : index
    %3 = vector.load %arg2[%c0, %c0_1, %c0_2] : memref<8x8x128xbf16, #tpu.memory_space<vmem>>, vector<8x8x128xbf16>
    %4 = vector.shape_cast %3 : vector<8x8x128xbf16> to vector<64x128xbf16>
    %c0_3 = arith.constant 0 : index
    %c0_4 = arith.constant 0 : index
    %5 = vector.load %arg3[%c0_3, %c0_4] : memref<128x128xbf16, #tpu.memory_space<vmem>>, vector<128x128xbf16>
    %cst = arith.constant dense<0.000000e+00> : vector<64x128xf32>
    %6 = tpu.matmul %4, %5, %cst {dimension_numbers = #tpu.dot_dimension_numbers<[1], [0], [0], [1], [0, 0, 1, 1], [], []>} : vector<64x128xbf16>, vector<128x128xbf16>, vector<64x128xf32> -> vector<64x128xf32>
    %c0_5 = arith.constant 0 : index
    %c0_6 = arith.constant 0 : index
    %7 = vector.load %arg5[%c0_5, %c0_6] : memref<1x128xf32, #tpu.memory_space<vmem>>, vector<1x128xf32>
    %8 = vector.broadcast %7 : vector<1x128xf32> to vector<64x128xf32>
    %9 = arith.addf %6, %8 : vector<64x128xf32>
    %c0_7 = arith.constant 0 : index
    %c0_8 = arith.constant 0 : index
    %10 = vector.load %arg7[%c0_7, %c0_8] : memref<64x128xf32, #tpu.memory_space<vmem>>, vector<64x128xf32>
    tpu.vector_store %arg7[%c0_7, %c0_8], %9 {strides = array<i32>} : memref<64x128xf32, #tpu.memory_space<vmem>>, vector<64x128xf32>,
    %c0_9 = arith.constant 0 : index
    %c0_10 = arith.constant 0 : index
    %11 = vector.load %arg4[%c0_9, %c0_10] : memref<128x128xbf16, #tpu.memory_space<vmem>>, vector<128x128xbf16>
    %c0_11 = arith.constant 0 : index
    %c0_12 = arith.constant 0 : index
    %12 = vector.load %arg8[%c0_11, %c0_12] : memref<8x128xf32, #tpu.memory_space<vmem>>, vector<8x128xf32>
    %c0_13 = arith.constant 0 : index
    %c0_14 = arith.constant 0 : index
    %13 = vector.load %arg7[%c0_13, %c0_14] : memref<64x128xf32, #tpu.memory_space<vmem>>, vector<8x128xf32>
    %14 = arith.truncf %12 : vector<8x128xf32> to vector<8x128xbf16>
    %cst_15 = arith.constant dense<0.000000e+00> : vector<8x128xf32>
    %15 = tpu.matmul %14, %11, %cst_15 {dimension_numbers = #tpu.dot_dimension_numbers<[1], [0], [0], [1], [0, 0, 1, 1], [], []>} : vector<8x128xbf16>, vector<128x128xbf16>, vector<8x128xf32> -> vector<8x128xf32>
    %16 = arith.addf %13, %15 : vector<8x128xf32>
    %17 = math.tanh %16 : vector<8x128xf32>
    %c8 = arith.constant 8 : index
    %c0_16 = arith.constant 0 : index
    %18 = vector.load %arg7[%c8, %c0_16] : memref<64x128xf32, #tpu.memory_space<vmem>>, vector<8x128xf32>
    %19 = arith.truncf %17 : vector<8x128xf32> to vector<8x128xbf16>
    %cst_17 = arith.constant dense<0.000000e+00> : vector<8x128xf32>
    %20 = tpu.matmul %19, %11, %cst_17 {dimension_numbers = #tpu.dot_dimension_numbers<[1], [0], [0], [1], [0, 0, 1, 1], [], []>} : vector<8x128xbf16>, vector<128x128xbf16>, vector<8x128xf32> -> vector<8x128xf32>
    %21 = arith.addf %18, %20 : vector<8x128xf32>
    %22 = math.tanh %21 : vector<8x128xf32>
    %c16 = arith.constant 16 : index
    %c0_18 = arith.constant 0 : index
    %23 = vector.load %arg7[%c16, %c0_18] : memref<64x128xf32, #tpu.memory_space<vmem>>, vector<8x128xf32>
    %24 = arith.truncf %22 : vector<8x128xf32> to vector<8x128xbf16>
    %cst_19 = arith.constant dense<0.000000e+00> : vector<8x128xf32>
    %25 = tpu.matmul %24, %11, %cst_19 {dimension_numbers = #tpu.dot_dimension_numbers<[1], [0], [0], [1], [0, 0, 1, 1], [], []>} : vector<8x128xbf16>, vector<128x128xbf16>, vector<8x128xf32> -> vector<8x128xf32>
    %26 = arith.addf %23, %25 : vector<8x128xf32>
    %27 = math.tanh %26 : vector<8x128xf32>
    %c24 = arith.constant 24 : index
    %c0_20 = arith.constant 0 : index
    %28 = vector.load %arg7[%c24, %c0_20] : memref<64x128xf32, #tpu.memory_space<vmem>>, vector<8x128xf32>
    %29 = arith.truncf %27 : vector<8x128xf32> to vector<8x128xbf16>
    %cst_21 = arith.constant dense<0.000000e+00> : vector<8x128xf32>
    %30 = tpu.matmul %29, %11, %cst_21 {dimension_numbers = #tpu.dot_dimension_numbers<[1], [0], [0], [1], [0, 0, 1, 1], [], []>} : vector<8x128xbf16>, vector<128x128xbf16>, vector<8x128xf32> -> vector<8x128xf32>
    %31 = arith.addf %28, %30 : vector<8x128xf32>
    %32 = math.tanh %31 : vector<8x128xf32>
    %c32 = arith.constant 32 : index
    %c0_22 = arith.constant 0 : index
    %33 = vector.load %arg7[%c32, %c0_22] : memref<64x128xf32, #tpu.memory_space<vmem>>, vector<8x128xf32>
    %34 = arith.truncf %32 : vector<8x128xf32> to vector<8x128xbf16>
    %cst_23 = arith.constant dense<0.000000e+00> : vector<8x128xf32>
    %35 = tpu.matmul %34, %11, %cst_23 {dimension_numbers = #tpu.dot_dimension_numbers<[1], [0], [0], [1], [0, 0, 1, 1], [], []>} : vector<8x128xbf16>, vector<128x128xbf16>, vector<8x128xf32> -> vector<8x128xf32>
    %36 = arith.addf %33, %35 : vector<8x128xf32>
    %37 = math.tanh %36 : vector<8x128xf32>
    %c40 = arith.constant 40 : index
    %c0_24 = arith.constant 0 : index
    %38 = vector.load %arg7[%c40, %c0_24] : memref<64x128xf32, #tpu.memory_space<vmem>>, vector<8x128xf32>
    %39 = arith.truncf %37 : vector<8x128xf32> to vector<8x128xbf16>
    %cst_25 = arith.constant dense<0.000000e+00> : vector<8x128xf32>
    %40 = tpu.matmul %39, %11, %cst_25 {dimension_numbers = #tpu.dot_dimension_numbers<[1], [0], [0], [1], [0, 0, 1, 1], [], []>} : vector<8x128xbf16>, vector<128x128xbf16>, vector<8x128xf32> -> vector<8x128xf32>
    %41 = arith.addf %38, %40 : vector<8x128xf32>
    %42 = math.tanh %41 : vector<8x128xf32>
    %c48 = arith.constant 48 : index
    %c0_26 = arith.constant 0 : index
    %43 = vector.load %arg7[%c48, %c0_26] : memref<64x128xf32, #tpu.memory_space<vmem>>, vector<8x128xf32>
    %44 = arith.truncf %42 : vector<8x128xf32> to vector<8x128xbf16>
    %cst_27 = arith.constant dense<0.000000e+00> : vector<8x128xf32>
    %45 = tpu.matmul %44, %11, %cst_27 {dimension_numbers = #tpu.dot_dimension_numbers<[1], [0], [0], [1], [0, 0, 1, 1], [], []>} : vector<8x128xbf16>, vector<128x128xbf16>, vector<8x128xf32> -> vector<8x128xf32>
    %46 = arith.addf %43, %45 : vector<8x128xf32>
    %47 = math.tanh %46 : vector<8x128xf32>
    %c56 = arith.constant 56 : index
    %c0_28 = arith.constant 0 : index
    %48 = vector.load %arg7[%c56, %c0_28] : memref<64x128xf32, #tpu.memory_space<vmem>>, vector<8x128xf32>
    %49 = arith.truncf %47 : vector<8x128xf32> to vector<8x128xbf16>
    %cst_29 = arith.constant dense<0.000000e+00> : vector<8x128xf32>
    %50 = tpu.matmul %49, %11, %cst_29 {dimension_numbers = #tpu.dot_dimension_numbers<[1], [0], [0], [1], [0, 0, 1, 1], [], []>} : vector<8x128xbf16>, vector<128x128xbf16>, vector<8x128xf32> -> vector<8x128xf32>
    %51 = arith.addf %48, %50 : vector<8x128xf32>
    %52 = math.tanh %51 : vector<8x128xf32>
    %c0_30 = arith.constant 0 : index
    %c0_31 = arith.constant 0 : index
    %53 = vector.load %arg8[%c0_30, %c0_31] : memref<8x128xf32, #tpu.memory_space<vmem>>, vector<8x128xf32>
    tpu.vector_store %arg8[%c0_30, %c0_31], %52 {strides = array<i32>} : memref<8x128xf32, #tpu.memory_space<vmem>>, vector<8x128xf32>,
    %c0_i32_32 = arith.constant 0 : i32
    %54 = arith.cmpi eq, %arg1, %c0_i32_32 : i32
    %55 = arith.extui %54 : i1 to i32
    %c0_i32_33 = arith.constant 0 : i32
    %56 = arith.cmpi ne, %55, %c0_i32_33 : i32
    scf.if %56 {
      %c0_34 = arith.constant 0 : index
      %c0_35 = arith.constant 0 : index
      %57 = vector.load %arg6[%c0_34, %c0_35] : memref<8x128xf32, #tpu.memory_space<vmem>>, vector<8x128xf32>
      tpu.vector_store %arg6[%c0_34, %c0_35], %52 {strides = array<i32>} : memref<8x128xf32, #tpu.memory_space<vmem>>, vector<8x128xf32>,
    } else {
    }
    return
  }
  func.func @transform_0(%arg0: i32, %arg1: i32) -> (i32, i32, i32) {
    %c0_i32 = arith.constant 0 : i32
    %c0_i32_0 = arith.constant 0 : i32
    return %arg1, %arg0, %c0_i32 : i32, i32, i32
  }
  func.func @transform_1(%arg0: i32, %arg1: i32) -> (i32, i32) {
    %c0_i32 = arith.constant 0 : i32
    %c0_i32_0 = arith.constant 0 : i32
    %c0_i32_1 = arith.constant 0 : i32
    return %c0_i32, %c0_i32_0 : i32, i32
  }
  func.func @transform_2(%arg0: i32, %arg1: i32) -> (i32, i32) {
    %c0_i32 = arith.constant 0 : i32
    %c0_i32_0 = arith.constant 0 : i32
    %c0_i32_1 = arith.constant 0 : i32
    return %c0_i32, %c0_i32_0 : i32, i32
  }
  func.func @transform_3(%arg0: i32, %arg1: i32) -> (i32, i32) {
    %c0_i32 = arith.constant 0 : i32
    %c0_i32_0 = arith.constant 0 : i32
    %c0_i32_1 = arith.constant 0 : i32
    return %c0_i32, %c0_i32_0 : i32, i32
  }
  func.func @transform_4(%arg0: i32, %arg1: i32) -> (i32, i32) {
    %c0_i32 = arith.constant 0 : i32
    %c0_i32_0 = arith.constant 0 : i32
    return %arg0, %c0_i32 : i32, i32
  }
}

</mosaic_0001>

<bundles_post_ra>
// kernel: rnn_forward.1
= control target key start
LH: loop header
LB: loop body
LE: loop exit
PB: predicated region body
PF: predicated region fallthrough
CT: control target
= control target key end

     0   :  { %v953_v0 = vmov 0.0   ;;  %vm954_vm0 = vmmov 0   ;;  %v955_v19 = vmov 0.0|0.0   ;;  %s1229_s1 = inlined_call_operand.vmem [shape: bf16[128,128], index: 1, kind: input, shape index: {}]   ;;  %s1230_s2 = inlined_call_operand.vmem [shape: bf16[128,128], index: 2, kind: input, shape index: {}]   ;;  %s1231_s0 = inlined_call_operand.vmem [shape: bf16[8,8,128], index: 0, kind: input, shape index: {}]   ;;  %s1232_s3 = inlined_call_operand.vmem [shape: f32[1,128], index: 3, kind: input, shape index: {}]   ;;  %s1233_s4 = inlined_call_operand.vmem [shape: f32[8,128], index: 4, kind: output, shape index: {}]  }
   0x1   :  { %754 = vmatprep.subr.bf16.mxu1 %v953_v0  ;;  %v917_v1 = vld [vmem:[%s1229_s1 + $0x38] sm:$0xff]   ;;  %770 = vmatprep.mubr.msk.bf16.mxu1 %vm954_vm0, %v953_v0  ;;  %v919_v3 = vld [vmem:[%s1229_s1 + $0x30] sm:$0xff]   ;;  %v921_v5 = vld [vmem:[%s1229_s1 + $0x28] sm:$0xff]  }
   0x2   :  { %v990_v2 = vld [vmem:[%s1230_s2 + $0x38] sm:$0xff]   ;;  %730 = vmatprep.subr.bf16.mxu0 %v917_v1  ;;  %v999_v4 = vld [vmem:[%s1230_s2 + $0x30] sm:$0xff]   ;;  %v1009_v6 = vld [vmem:[%s1230_s2 + $0x28] sm:$0xff]  }
   0x3   :  { %755 = vmatpush3.bf16.msra.mxu1 %v990_v2  ;;  %731 = vmatpush3.bf16.msra.mxu0 %v917_v1  ;;  %v923_v7 = vld [vmem:[%s1229_s1 + $0x20] sm:$0xff]   ;;  %v925_v9 = vld [vmem:[%s1229_s1 + $0x18] sm:$0xff]   ;;  %v927_v11 = vld [vmem:[%s1229_s1 + $0x10] sm:$0xff]  }
   0x4   :  { %756 = vmatprep.subr.bf16.mxu1 %v953_v0  ;;  %732 = vmatprep.subr.bf16.mxu0 %v919_v3  ;;  %v1019_v8 = vld [vmem:[%s1230_s2 + $0x20] sm:$0xff]   ;;  %v1028_v10 = vld [vmem:[%s1230_s2 + $0x18] sm:$0xff]   ;;  %v1042_v13 = vld [vmem:[%s1230_s2 + $0x10] sm:$0xff]  }
   0x5   :  { %v933_v12 = vld [vmem:[%s1231_s0] sm:$0xff]   ;;  %v929_v14 = vld [vmem:[%s1229_s1 + $0x8] sm:$0xff]   ;;  %v935_v20 = vld [vmem:[%s1231_s0 + $0x10] sm:$0xff]  }
   0x6   :  { %746 = vmatprep.mubr.bf16.mxu0 %v933_v12  ;;  %v1052_v15 = vld [vmem:[%s1230_s2 + $0x8] sm:$0xff]   ;;  %v931_v16 = vld [vmem:[%s1229_s1] sm:$0xff]   ;;  %v936_v21 = vld [vmem:[%s1231_s0 + $0x18] sm:$0xff]  }
   0x7   :  { %757 = vmatpush3.bf16.msra.mxu1 %v999_v4  ;;  %733 = vmatpush3.bf16.msra.mxu0 %v919_v3  ;;  %v1062_v17 = vld [vmem:[%s1230_s2] sm:$0xff]   ;;  %v934_v18 = vld [vmem:[%s1231_s0 + $0x8] sm:$0xff]  }
   0x8   :  { %758 = vmatprep.subr.bf16.mxu1 %v953_v0  ;;  %734 = vmatprep.subr.bf16.mxu0 %v921_v5  ;;  %v1116_v24 = vld [vmem:[%s1232_s3] ss:$0 sm:$0xff] }
   0xb   :  { %759 = vmatpush3.bf16.msra.mxu1 %v1009_v6  ;;  %735 = vmatpush3.bf16.msra.mxu0 %v921_v5 }
   0xc   :  { %760 = vmatprep.subr.bf16.mxu1 %v953_v0  ;;  %736 = vmatprep.subr.bf16.mxu0 %v923_v7 }
   0xf   :  { %761 = vmatpush3.bf16.msra.mxu1 %v1019_v8  ;;  %737 = vmatpush3.bf16.msra.mxu0 %v923_v7 }
  0x10   :  { %762 = vmatprep.subr.bf16.mxu1 %v953_v0  ;;  %738 = vmatprep.subr.bf16.mxu0 %v925_v9 }
  0x13   :  { %763 = vmatpush3.bf16.msra.mxu1 %v1028_v10  ;;  %739 = vmatpush3.bf16.msra.mxu0 %v925_v9 }
  0x14   :  { %764 = vmatprep.subr.bf16.mxu1 %v953_v0  ;;  %740 = vmatprep.subr.bf16.mxu0 %v927_v11 }
  0x17   :  { %765 = vmatpush3.bf16.msra.mxu1 %v1042_v13  ;;  %741 = vmatpush3.bf16.msra.mxu0 %v927_v11 }
  0x18   :  { %766 = vmatprep.subr.bf16.mxu1 %v953_v0  ;;  %742 = vmatprep.subr.bf16.mxu0 %v929_v14 }
  0x1b   :  { %767 = vmatpush3.bf16.msra.mxu1 %v1052_v15  ;;  %743 = vmatpush3.bf16.msra.mxu0 %v929_v14 }
  0x1c   :  { %768 = vmatprep.subr.bf16.mxu1 %v953_v0  ;;  %744 = vmatprep.subr.bf16.mxu0 %v931_v16 }
  0x1f   :  { %769 = vmatpush3.bf16.msra.mxu1 %v1062_v17  ;;  %745 = vmatpush3.bf16.msra.mxu0 %v931_v16 }
  0x20   :  { %774 = vmatprep.subr.bf16.mxu0 %v953_v0  ;;  %794 = vmatprep.subr.bf16.mxu1 %v953_v0 }
  0x22   :  { %771 = vmatmul.mubr.bf16.vlgmr.msra.gmra.mxu1 %v955_v19  ;;  %747 = vmatmul.mubr.bf16.vlgmr.msra.gmra.mxu0 %v934_v18 }
  0x23   :  { %775 = vmatpush3.bf16.msra.mxu0 %v990_v2  ;;  %795 = vmatpush3.bf16.msra.mxu1 %v990_v2 }
  0x24   :  { %776 = vmatprep.subr.bf16.mxu0 %v953_v0  ;;  %796 = vmatprep.subr.bf16.mxu1 %v953_v0 }
  0x25   :  { %810 = vmatprep.mubr.msk.bf16.mxu1 %vm954_vm0, %v953_v0  ;;  %750 = vmatprep.mubr.bf16.mxu0 %v935_v20 }
  0x27   :  { %777 = vmatpush3.bf16.msra.mxu0 %v999_v4  ;;  %797 = vmatpush3.bf16.msra.mxu1 %v999_v4 }
  0x28   :  { %778 = vmatprep.subr.bf16.mxu0 %v953_v0  ;;  %798 = vmatprep.subr.bf16.mxu1 %v953_v0 }
  0x2a   :  { %751 = vmatmul.mubr.bf16.gmra.mxu0 %v936_v21 }
  0x2b   :  { %779 = vmatpush3.bf16.msra.mxu0 %v1009_v6  ;;  %799 = vmatpush3.bf16.msra.mxu1 %v1009_v6 }
  0x2c   :  { %780 = vmatprep.subr.bf16.mxu0 %v953_v0  ;;  %800 = vmatprep.subr.bf16.mxu1 %v953_v0 }
  0x2d   :  { %790 = vmatprep.mubr.msk.bf16.mxu0 %vm954_vm0, %v953_v0 }
  0x2f   :  { %781 = vmatpush3.bf16.msra.mxu0 %v1019_v8  ;;  %801 = vmatpush3.bf16.msra.mxu1 %v1019_v8 }
  0x30   :  { %782 = vmatprep.subr.bf16.mxu0 %v953_v0  ;;  %802 = vmatprep.subr.bf16.mxu1 %v953_v0 }
  0x33   :  { %783 = vmatpush3.bf16.msra.mxu0 %v1028_v10  ;;  %803 = vmatpush3.bf16.msra.mxu1 %v1028_v10 }
  0x34   :  { %784 = vmatprep.subr.bf16.mxu0 %v953_v0  ;;  %804 = vmatprep.subr.bf16.mxu1 %v953_v0 }
  0x37   :  { %785 = vmatpush3.bf16.msra.mxu0 %v1042_v13  ;;  %805 = vmatpush3.bf16.msra.mxu1 %v1042_v13 }
  0x38   :  { %786 = vmatprep.subr.bf16.mxu0 %v953_v0  ;;  %806 = vmatprep.subr.bf16.mxu1 %v953_v0 }
  0x3b   :  { %787 = vmatpush3.bf16.msra.mxu0 %v1052_v15  ;;  %807 = vmatpush3.bf16.msra.mxu1 %v1052_v15 }
  0x3c   :  { %788 = vmatprep.subr.bf16.mxu0 %v953_v0  ;;  %808 = vmatprep.subr.bf16.mxu1 %v953_v0 }
  0x3f   :  { %789 = vmatpush3.bf16.msra.mxu0 %v1062_v17  ;;  %809 = vmatpush3.bf16.msra.mxu1 %v1062_v17 }
  0x40   :  { %814 = vmatprep.subr.bf16.mxu0 %v953_v0  ;;  %834 = vmatprep.subr.bf16.mxu1 %v953_v0 }
  0xe2   :  { %v300_v22 = vpop.f32.mrf.mxu1  ;;  %v748_v23 = vpop.f32.mrf.mxu0 }
  0xe3   :  { %v169_v47 = vadd.f32 %v748_v23, %v1116_v24 }
  0xe4   :  { %v772_v25 = vpop.f32.mrf.mxu1  ;;  %v160_v26 = vpop.f32.mrf.mxu0 }
  0xe5   :  { %v161_v27 = vadd.f32 %v1116_v24, %v160_v26 }
  0xe6   :  { %v303_v28 = vpop.f32.mrf.mxu1  ;;  %v749_v33 = vpop.f32.mrf.mxu0 }
  0xe7   :  { %v306_v29 = vadd.f32 %v300_v22, %v161_v27  ;;  %v172_v55 = vadd.f32 %v749_v33, %v1116_v24 }
  0xe8   :  { %v773_v30 = vpop.f32.mrf.mxu1  ;;  %v163_v34 = vpop.f32.mrf.mxu0 }
  0xe9   :  { %937 = vtanh.f32 %v306_v29  ;;  %v164_v39 = vadd.f32 %v1116_v24, %v163_v34 }
  0xea   :  { %v1137_v35 = vpop.f32.mrf.mxu0 }
  0xec   :  { %v1139_v36 = vpop.f32.mrf.mxu0 }
  0xed   :  { %v177_v63 = vadd.f32 %v1116_v24, %v1139_v36 }
  0xee   :  { %v1141_v37 = vpop.f32.mrf.mxu0 }
  0xef   :  { %v188_v23 = vadd.f32 %v1141_v37, %v1116_v24 }
  0xf0   :  { %v1143_v38 = vpop.f32.mrf.mxu0 }
  0xf6   :  { %v938_v31 = vpop.eup %937 }
  0xf7   :  { %v309_v32 = vpack.c.bf16 %v938_v31, %v938_v31 }
  0xf9   :  { %791 = vmatmul.mubr.bf16.vlgmr.msra.gmra.mxu0 %v309_v32 }
  0xfa   :  { %815 = vmatpush3.bf16.msra.mxu0 %v990_v2  ;;  %830 = vmatprep.mubr.msk.bf16.mxu0 %vm954_vm0, %v953_v0 }
  0xfb   :  { %816 = vmatprep.subr.bf16.mxu0 %v953_v0 }
  0xfe   :  { %817 = vmatpush3.bf16.msra.mxu0 %v999_v4 }
  0xff   :  { %818 = vmatprep.subr.bf16.mxu0 %v953_v0 }
 0x102   :  { %819 = vmatpush3.bf16.msra.mxu0 %v1009_v6 }
 0x103   :  { %820 = vmatprep.subr.bf16.mxu0 %v953_v0 }
 0x106   :  { %821 = vmatpush3.bf16.msra.mxu0 %v1019_v8 }
 0x107   :  { %822 = vmatprep.subr.bf16.mxu0 %v953_v0 }
 0x10a   :  { %823 = vmatpush3.bf16.msra.mxu0 %v1028_v10 }
 0x10b   :  { %824 = vmatprep.subr.bf16.mxu0 %v953_v0 }
 0x10e   :  { %825 = vmatpush3.bf16.msra.mxu0 %v1042_v13 }
 0x10f   :  { %826 = vmatprep.subr.bf16.mxu0 %v953_v0 }
 0x112   :  { %827 = vmatpush3.bf16.msra.mxu0 %v1052_v15 }
 0x113   :  { %828 = vmatprep.subr.bf16.mxu0 %v953_v0 }
 0x116   :  { %829 = vmatpush3.bf16.msra.mxu0 %v1062_v17 }
 0x117   :  { %854 = vmatprep.subr.bf16.mxu0 %v953_v0 }
 0x1b9   :  { %v344_v40 = vpop.f32.mrf.mxu0 }
 0x1ba   :  { %v350_v41 = vadd.f32 %v344_v40, %v164_v39 }
 0x1bb   :  { %v792_v42 = vpop.f32.mrf.mxu0 }
 0x1bc   :  { %939 = vtanh.f32 %v350_v41 }
 0x1bd   :  { %v347_v43 = vpop.f32.mrf.mxu0 }
 0x1bf   :  { %v793_v44 = vpop.f32.mrf.mxu0 }
 0x1c9   :  { %v940_v45 = vpop.eup %939 }
 0x1ca   :  { %v353_v46 = vpack.c.bf16 %v940_v45, %v940_v45 }
 0x1cc   :  { %811 = vmatmul.mubr.bf16.vlgmr.msra.gmra.mxu1 %v353_v46 }
 0x1cd   :  { %835 = vmatpush3.bf16.msra.mxu1 %v990_v2  ;;  %850 = vmatprep.mubr.msk.bf16.mxu1 %vm954_vm0, %v953_v0 }
 0x1ce   :  { %836 = vmatprep.subr.bf16.mxu1 %v953_v0 }
 0x1d1   :  { %837 = vmatpush3.bf16.msra.mxu1 %v999_v4 }
 0x1d2   :  { %838 = vmatprep.subr.bf16.mxu1 %v953_v0 }
 0x1d5   :  { %839 = vmatpush3.bf16.msra.mxu1 %v1009_v6 }
 0x1d6   :  { %840 = vmatprep.subr.bf16.mxu1 %v953_v0 }
 0x1d9   :  { %841 = vmatpush3.bf16.msra.mxu1 %v1019_v8 }
 0x1da   :  { %842 = vmatprep.subr.bf16.mxu1 %v953_v0 }
 0x1dd   :  { %843 = vmatpush3.bf16.msra.mxu1 %v1028_v10 }
 0x1de   :  { %844 = vmatprep.subr.bf16.mxu1 %v953_v0 }
 0x1e1   :  { %845 = vmatpush3.bf16.msra.mxu1 %v1042_v13 }
 0x1e2   :  { %846 = vmatprep.subr.bf16.mxu1 %v953_v0 }
 0x1e5   :  { %847 = vmatpush3.bf16.msra.mxu1 %v1052_v15 }
 0x1e6   :  { %848 = vmatprep.subr.bf16.mxu1 %v953_v0 }
 0x1e9   :  { %849 = vmatpush3.bf16.msra.mxu1 %v1062_v17 }
 0x1ea   :  { %874 = vmatprep.subr.bf16.mxu1 %v953_v0 }
 0x28c   :  { %v388_v48 = vpop.f32.mrf.mxu1 }
 0x28d   :  { %v394_v49 = vadd.f32 %v388_v48, %v169_v47 }
 0x28e   :  { %v812_v50 = vpop.f32.mrf.mxu1 }
 0x28f   :  { %941 = vtanh.f32 %v394_v49 }
 0x290   :  { %v391_v51 = vpop.f32.mrf.mxu1 }
 0x292   :  { %v813_v52 = vpop.f32.mrf.mxu1 }
 0x29c   :  { %v942_v53 = vpop.eup %941 }
 0x29d   :  { %v397_v54 = vpack.c.bf16 %v942_v53, %v942_v53 }
 0x29f   :  { %831 = vmatmul.mubr.bf16.vlgmr.msra.gmra.mxu0 %v397_v54 }
 0x2a0   :  { %855 = vmatpush3.bf16.msra.mxu0 %v990_v2  ;;  %870 = vmatprep.mubr.msk.bf16.mxu0 %vm954_vm0, %v953_v0 }
 0x2a1   :  { %856 = vmatprep.subr.bf16.mxu0 %v953_v0 }
 0x2a4   :  { %857 = vmatpush3.bf16.msra.mxu0 %v999_v4 }
 0x2a5   :  { %858 = vmatprep.subr.bf16.mxu0 %v953_v0 }
 0x2a8   :  { %859 = vmatpush3.bf16.msra.mxu0 %v1009_v6 }
 0x2a9   :  { %860 = vmatprep.subr.bf16.mxu0 %v953_v0 }
 0x2ac   :  { %861 = vmatpush3.bf16.msra.mxu0 %v1019_v8 }
 0x2ad   :  { %862 = vmatprep.subr.bf16.mxu0 %v953_v0 }
 0x2b0   :  { %863 = vmatpush3.bf16.msra.mxu0 %v1028_v10 }
 0x2b1   :  { %864 = vmatprep.subr.bf16.mxu0 %v953_v0 }
 0x2b4   :  { %865 = vmatpush3.bf16.msra.mxu0 %v1042_v13 }
 0x2b5   :  { %866 = vmatprep.subr.bf16.mxu0 %v953_v0 }
 0x2b8   :  { %867 = vmatpush3.bf16.msra.mxu0 %v1052_v15 }
 0x2b9   :  { %868 = vmatprep.subr.bf16.mxu0 %v953_v0 }
 0x2bc   :  { %869 = vmatpush3.bf16.msra.mxu0 %v1062_v17 }
 0x2bd   :  { %894 = vmatprep.subr.bf16.mxu0 %v953_v0 }
 0x35f   :  { %v432_v56 = vpop.f32.mrf.mxu0 }
 0x360   :  { %v438_v57 = vadd.f32 %v432_v56, %v172_v55 }
 0x361   :  { %v832_v58 = vpop.f32.mrf.mxu0 }
 0x362   :  { %943 = vtanh.f32 %v438_v57 }
 0x363   :  { %v435_v59 = vpop.f32.mrf.mxu0 }
 0x365   :  { %v833_v60 = vpop.f32.mrf.mxu0 }
 0x36f   :  { %v944_v61 = vpop.eup %943 }
 0x370   :  { %v441_v62 = vpack.c.bf16 %v944_v61, %v944_v61 }
 0x372   :  { %851 = vmatmul.mubr.bf16.vlgmr.msra.gmra.mxu1 %v441_v62 }
 0x373   :  { %875 = vmatpush3.bf16.msra.mxu1 %v990_v2  ;;  %890 = vmatprep.mubr.msk.bf16.mxu1 %vm954_vm0, %v953_v0 }
 0x374   :  { %876 = vmatprep.subr.bf16.mxu1 %v953_v0 }
 0x377   :  { %877 = vmatpush3.bf16.msra.mxu1 %v999_v4 }
 0x378   :  { %878 = vmatprep.subr.bf16.mxu1 %v953_v0 }
 0x37b   :  { %879 = vmatpush3.bf16.msra.mxu1 %v1009_v6 }
 0x37c   :  { %880 = vmatprep.subr.bf16.mxu1 %v953_v0 }
 0x37f   :  { %881 = vmatpush3.bf16.msra.mxu1 %v1019_v8 }
 0x380   :  { %882 = vmatprep.subr.bf16.mxu1 %v953_v0 }
 0x383   :  { %883 = vmatpush3.bf16.msra.mxu1 %v1028_v10 }
 0x384   :  { %884 = vmatprep.subr.bf16.mxu1 %v953_v0 }
 0x387   :  { %885 = vmatpush3.bf16.msra.mxu1 %v1042_v13 }
 0x388   :  { %886 = vmatprep.subr.bf16.mxu1 %v953_v0 }
 0x38b   :  { %887 = vmatpush3.bf16.msra.mxu1 %v1052_v15 }
 0x38c   :  { %888 = vmatprep.subr.bf16.mxu1 %v953_v0 }
 0x38f   :  { %889 = vmatpush3.bf16.msra.mxu1 %v1062_v17 }
 0x432   :  { %v476_v1 = vpop.f32.mrf.mxu1 }
 0x433   :  { %v482_v3 = vadd.f32 %v476_v1, %v177_v63 }
 0x434   :  { %v852_v5 = vpop.f32.mrf.mxu1 }
 0x435   :  { %945 = vtanh.f32 %v482_v3 }
 0x436   :  { %v479_v7 = vpop.f32.mrf.mxu1 }
 0x438   :  { %v853_v9 = vpop.f32.mrf.mxu1 }
 0x442   :  { %v946_v11 = vpop.eup %945 }
 0x443   :  { %v485_v12 = vpack.c.bf16 %v946_v11, %v946_v11 }
 0x445   :  { %871 = vmatmul.mubr.bf16.vlgmr.msra.gmra.mxu0 %v485_v12 }
 0x446   :  { %895 = vmatpush3.bf16.msra.mxu0 %v990_v2  ;;  %910 = vmatprep.mubr.msk.bf16.mxu0 %vm954_vm0, %v953_v0  ;;  %v180_v2 = vadd.f32 %v1116_v24, %v1143_v38 }
 0x447   :  { %896 = vmatprep.subr.bf16.mxu0 %v953_v0 }
 0x44a   :  { %897 = vmatpush3.bf16.msra.mxu0 %v999_v4 }
 0x44b   :  { %898 = vmatprep.subr.bf16.mxu0 %v953_v0 }
 0x44e   :  { %899 = vmatpush3.bf16.msra.mxu0 %v1009_v6 }
 0x44f   :  { %900 = vmatprep.subr.bf16.mxu0 %v953_v0 }
 0x452   :  { %901 = vmatpush3.bf16.msra.mxu0 %v1019_v8 }
 0x453   :  { %902 = vmatprep.subr.bf16.mxu0 %v953_v0 }
 0x456   :  { %903 = vmatpush3.bf16.msra.mxu0 %v1028_v10 }
 0x457   :  { %904 = vmatprep.subr.bf16.mxu0 %v953_v0 }
 0x45a   :  { %905 = vmatpush3.bf16.msra.mxu0 %v1042_v13  ;;  %v185_v13 = vadd.f32 %v1137_v35, %v1116_v24 }
 0x45b   :  { %906 = vmatprep.subr.bf16.mxu0 %v953_v0 }
 0x45e   :  { %907 = vmatpush3.bf16.msra.mxu0 %v1052_v15 }
 0x45f   :  { %908 = vmatprep.subr.bf16.mxu0 %v953_v0 }
 0x462   :  { %909 = vmatpush3.bf16.msra.mxu0 %v1062_v17 }
 0x505   :  { %v520_v4 = vpop.f32.mrf.mxu0 }
 0x506   :  { %v526_v6 = vadd.f32 %v520_v4, %v180_v2 }
 0x507   :  { %v872_v8 = vpop.f32.mrf.mxu0 }
 0x508   :  { %947 = vtanh.f32 %v526_v6 }
 0x509   :  { %v523_v10 = vpop.f32.mrf.mxu0 }
 0x50b   :  { %v873_v14 = vpop.f32.mrf.mxu0 }
 0x515   :  { %v948_v16 = vpop.eup %947 }
 0x516   :  { %v529_v18 = vpack.c.bf16 %v948_v16, %v948_v16 }
 0x518   :  { %891 = vmatmul.mubr.bf16.vlgmr.msra.gmra.mxu1 %v529_v18 }
 0x5d8   :  { %v564_v15 = vpop.f32.mrf.mxu1 }
 0x5d9   :  { %v570_v19 = vadd.f32 %v564_v15, %v185_v13 }
 0x5da   :  { %v892_v0 = vpop.f32.mrf.mxu1 }
 0x5db   :  { %949 = vtanh.f32 %v570_v19 }
 0x5dc   :  { %v567_v17 = vpop.f32.mrf.mxu1 }
 0x5de   :  { %v893_v20 = vpop.f32.mrf.mxu1 }
 0x5e8   :  { %v950_v21 = vpop.eup %949 }
 0x5e9   :  { %v573_v22 = vpack.c.bf16 %v950_v21, %v950_v21 }
 0x5eb   :  { %911 = vmatmul.mubr.bf16.vlgmr.msra.gmra.mxu0 %v573_v22 }
 0x6ab   :  { %v608_v25 = vpop.f32.mrf.mxu0 }
 0x6ac   :  { %v614_v26 = vadd.f32 %v608_v25, %v188_v23 }
 0x6ad   :  { %v912_v27 = vpop.f32.mrf.mxu0 }
 0x6ae   :  { %951 = vtanh.f32 %v614_v26 }
 0x6af   :  { %v611_v28 = vpop.f32.mrf.mxu0 }
 0x6b1   :  { %v913_v29 = vpop.f32.mrf.mxu0 }
 0x6bb   :  { %v952_v30 = vpop.eup %951 }
 0x6bc   :  { %620 = vst [vmem:[%s1233_s4] sm:$0xff] %v952_v30 }

</bundles_post_ra>
